<compile_context>
chip_gen: v7x
topology: tpu7x:2x2x1
jax: 0.10.0
libtpu: 0.0.40
codegen_flags: <defaults>
</compile_context>

<pallas_src>
import math

import jax
import jax.numpy as jnp
from jax.experimental import pallas as pl
from jax.experimental.pallas import tpu as pltpu


def _round_up(x, m):
    return ((x + m - 1) // m) * m


def embed_bag_kernel(indices_ref, scores_ref, weight_ref, out_ref, acc_ref):
    """One (batch tile, NE tile) step: acc[b, c] += sum_n s[b, n] * W[idx[b, n], c]."""
    j = pl.program_id(1)  # NE (reduction) axis — trailing, "arbitrary"

    @pl.when(j == 0)
    def _():
        acc_ref[...] = jnp.zeros_like(acc_ref)

    idx = indices_ref[...]                          # (TB, N) int32
    s = scores_ref[...].astype(jnp.float32)         # (TB, N) f32 — VPU math stays f32
    w = weight_ref[...]                             # (TNE, C) native dtype -> MXU

    tb, n = idx.shape
    tne = w.shape[0]

    # Global embedding ids covered by this NE tile.
    e_ids = jax.lax.broadcasted_iota(jnp.int32, (tb, tne), 1) + j * tne

    # Scaled one-hot A[b, e] = sum_n scores[b, n] * (idx[b, n] == e).
    # Built as a 2-D accumulate, fully unrolled over the small static bag dim N
    # (pure VPU compare/select/add; no (TB, N, NE) intermediate, no XLU reduce).
    a = jnp.zeros((tb, tne), dtype=jnp.float32)
    for nn in range(n):
        a = a + jnp.where(idx[:, nn:nn + 1] == e_ids, s[:, nn:nn + 1], 0.0)

    # The MXU does the gather + weighted-sum reduction; feed it the table's
    # native dtype (full-rate bf16 path when the table is bf16).
    acc_ref[...] += jnp.dot(a.astype(w.dtype), w, preferred_element_type=jnp.float32)

    @pl.when(j == pl.num_programs(1) - 1)
    def _():
        out_ref[...] = acc_ref[...].astype(out_ref.dtype)


def sparse_embedding_bag_forward(indices, scores, weight, *, out_dtype=jnp.float32,
                                 tb=256, tne=512):
    """JAX wrapper: flatten batch dims, tile over (batch, NE), call the Pallas kernel."""
    batch_shape = indices.shape[:-1]
    n = indices.shape[-1]
    ne, c = weight.shape
    b = math.prod(batch_shape) if batch_shape else 1

    idx2 = indices.reshape(b, n).astype(jnp.int32)
    s2 = scores.reshape(b, n)          # keep caller's score dtype (no round-trip cast)

    # ---- tile sizing; ragged batch / NE handled by zero padding ----
    tb_eff = min(tb, _round_up(b, 8))          # multiple of 8; don't over-tile tiny B
    b_pad = _round_up(b, tb_eff)
    tne_eff = min(tne, _round_up(ne, 8))
    ne_pad = _round_up(ne, tne_eff)

    if b_pad != b:
        idx2 = jnp.pad(idx2, ((0, b_pad - b), (0, 0)))      # idx 0, score 0 -> no-op rows
        s2 = jnp.pad(s2, ((0, b_pad - b), (0, 0)))
    w_p = weight if ne_pad == ne else jnp.pad(weight, ((0, ne_pad - ne), (0, 0)))

    grid = (b_pad // tb_eff, ne_pad // tne_eff)

    w_bytes = jnp.dtype(weight.dtype).itemsize
    out_bytes = jnp.dtype(out_dtype).itemsize
    s_bytes = jnp.dtype(s2.dtype).itemsize
    cost = pl.CostEstimate(
        flops=2 * b_pad * ne_pad * c,
        transcendentals=0,
        bytes_accessed=(b_pad * n * (4 + s_bytes)
                        + grid[0] * ne_pad * c * w_bytes     # table streamed per batch tile
                        + b_pad * c * out_bytes),
    )

    # Explicit VMEM budget: double-buffered weight / out / input tiles + f32
    # accumulator + one-hot staging.  Clamped for v7x's 64 MiB physical VMEM.
    vmem_bytes = (2 * (tne_eff * c * w_bytes
                       + tb_eff * c * out_bytes
                       + tb_eff * n * (4 + s_bytes))
                  + tb_eff * c * 4
                  + 2 * tb_eff * tne_eff * 4)
    vmem_limit = min(max(32 << 20, vmem_bytes + (4 << 20)), 64 << 20)

    out = pl.pallas_call(
        embed_bag_kernel,
        out_shape=jax.ShapeDtypeStruct((b_pad, c), out_dtype),
        grid_spec=pltpu.PrefetchScalarGridSpec(
            num_scalar_prefetch=0,
            grid=grid,
            in_specs=[
                pl.BlockSpec((tb_eff, n), lambda i, j: (i, 0)),     # indices tile
                pl.BlockSpec((tb_eff, n), lambda i, j: (i, 0)),     # scores tile
                pl.BlockSpec((tne_eff, c), lambda i, j: (j, 0)),    # weight NE tile
            ],
            out_specs=pl.BlockSpec((tb_eff, c), lambda i, j: (i, 0)),
            scratch_shapes=[pltpu.VMEM((tb_eff, c), jnp.float32)],  # f32 accumulator
        ),
        compiler_params=pltpu.CompilerParams(
            dimension_semantics=("parallel", "arbitrary"),
            vmem_limit_bytes=vmem_limit,
        ),
        cost_estimate=cost,
    )(idx2, s2, w_p)

    out = out[:b]
    return out.reshape(batch_shape + (c,))


if __name__ == "__main__":
    # Module config (small, consistent with SparseEmbeddingBag.__init__):
    num_embeddings = 64      # NE
    embedding_dim = 128      # C
    std = 0.01

    # Inputs: batch shape (2, 8), bag size N = 8.
    batch_shape = (2, 8)
    n_bag = 8

    key = jax.random.PRNGKey(0)
    k_w, k_idx, k_sc = jax.random.split(key, 3)

    # Deterministic parameter init: weight ~ N(0, std^2), shape (NE, C).
    weight = (std * jax.random.normal(k_w, (num_embeddings, embedding_dim))).astype(jnp.float32)

    indices = jax.random.randint(k_idx, batch_shape + (n_bag,), 0, num_embeddings, dtype=jnp.int32)
    scores = jax.random.normal(k_sc, batch_shape + (n_bag,), dtype=jnp.float32)

    out = sparse_embedding_bag_forward(indices, scores, weight, out_dtype=jnp.float32)
    out = jax.block_until_ready(out)

    # Pure-JAX reference: (weight[indices] * scores[..., None]).sum(-2)
    ref = jnp.sum(weight[indices] * scores[..., None], axis=-2)

    assert out.shape == batch_shape + (embedding_dim,)
    assert jnp.allclose(out, ref, atol=1e-5, rtol=1e-5), "mismatch vs reference"

    print("KERNEL_OK")
</pallas_src>

<mosaic_0001>
module attributes {stable_mosaic.version = 11 : i64} {
  func.func @embed_bag_kernel(%arg0: i32, %arg1: i32, %arg2: memref<16x8xi32, #tpu.memory_space<vmem>>, %arg3: memref<16x8xf32, #tpu.memory_space<vmem>>, %arg4: memref<64x128xf32, #tpu.memory_space<vmem>>, %arg5: memref<16x128xf32, #tpu.memory_space<vmem>>, %arg6: memref<16x128xf32, #tpu.memory_space<vmem>>) attributes {dimension_semantics = [#tpu.dimension_semantics<parallel>, #tpu.dimension_semantics<arbitrary>], iteration_bounds = array<i64: 1, 1>, scalar_prefetch = 0 : i64, scratch_operands = 1 : i64, tpu.core_type = #tpu.core_type<tc>, window_params = [{transform_indices = @transform_0, window_bounds = array<i64: 16, 8>}, {transform_indices = @transform_1, window_bounds = array<i64: 16, 8>}, {transform_indices = @transform_2, window_bounds = array<i64: 64, 128>}, {transform_indices = @transform_3, window_bounds = array<i64: 16, 128>}]} {
    %c0_i32 = arith.constant 0 : i32
    %0 = arith.cmpi eq, %arg1, %c0_i32 : i32
    %1 = arith.extui %0 : i1 to i32
    %c0_i32_0 = arith.constant 0 : i32
    %2 = arith.cmpi ne, %1, %c0_i32_0 : i32
    scf.if %2 {
      %cst_21 = arith.constant 0.000000e+00 : f32
      %90 = vector.broadcast %cst_21 : f32 to vector<16x128xf32>
      %c0_22 = arith.constant 0 : index
      %c0_23 = arith.constant 0 : index
      %91 = vector.load %arg6[%c0_22, %c0_23] : memref<16x128xf32, #tpu.memory_space<vmem>>, vector<16x128xf32>
      tpu.vector_store %arg6[%c0_22, %c0_23], %90 {strides = array<i32>} : memref<16x128xf32, #tpu.memory_space<vmem>>, vector<16x128xf32>,
    } else {
    }
    %c0 = arith.constant 0 : index
    %c0_1 = arith.constant 0 : index
    %3 = vector.load %arg2[%c0, %c0_1] : memref<16x8xi32, #tpu.memory_space<vmem>>, vector<16x8xi32>
    %c0_2 = arith.constant 0 : index
    %c0_3 = arith.constant 0 : index
    %4 = vector.load %arg3[%c0_2, %c0_3] : memref<16x8xf32, #tpu.memory_space<vmem>>, vector<16x8xf32>
    %c0_4 = arith.constant 0 : index
    %c0_5 = arith.constant 0 : index
    %5 = vector.load %arg4[%c0_4, %c0_5] : memref<64x128xf32, #tpu.memory_space<vmem>>, vector<64x128xf32>
    %6 = tpu.iota {dimensions = array<i32: 1>} : vector<16x64xi32>
    %c64_i32 = arith.constant 64 : i32
    %7 = arith.muli %arg1, %c64_i32 : i32
    %8 = vector.broadcast %7 : i32 to vector<16x64xi32>
    %9 = arith.addi %6, %8 : vector<16x64xi32>
    %cst = arith.constant 0.000000e+00 : f32
    %10 = vector.broadcast %cst : f32 to vector<16x64xf32>
    %11 = vector.extract_strided_slice %3 {offsets = [0, 0], sizes = [16, 1], strides = [1, 1]} : vector<16x8xi32> to vector<16x1xi32>
    %12 = vector.broadcast %11 : vector<16x1xi32> to vector<16x64xi32>
    %13 = arith.cmpi eq, %12, %9 : vector<16x64xi32>
    %14 = vector.extract_strided_slice %4 {offsets = [0, 0], sizes = [16, 1], strides = [1, 1]} : vector<16x8xf32> to vector<16x1xf32>
    %cst_6 = arith.constant 0.000000e+00 : f32
    %15 = vector.shape_cast %14 : vector<16x1xf32> to vector<16x1xf32>
    %16 = vector.broadcast %15 : vector<16x1xf32> to vector<16x64xf32>
    %17 = vector.broadcast %cst_6 : f32 to vector<16x64xf32>
    %18 = arith.select %13, %16, %17 : vector<16x64xi1>, vector<16x64xf32>
    %19 = arith.addf %10, %18 : vector<16x64xf32>
    %20 = vector.extract_strided_slice %3 {offsets = [0, 1], sizes = [16, 1], strides = [1, 1]} : vector<16x8xi32> to vector<16x1xi32>
    %21 = vector.broadcast %20 : vector<16x1xi32> to vector<16x64xi32>
    %22 = arith.cmpi eq, %21, %9 : vector<16x64xi32>
    %23 = vector.extract_strided_slice %4 {offsets = [0, 1], sizes = [16, 1], strides = [1, 1]} : vector<16x8xf32> to vector<16x1xf32>
    %cst_7 = arith.constant 0.000000e+00 : f32
    %24 = vector.shape_cast %23 : vector<16x1xf32> to vector<16x1xf32>
    %25 = vector.broadcast %24 : vector<16x1xf32> to vector<16x64xf32>
    %26 = vector.broadcast %cst_7 : f32 to vector<16x64xf32>
    %27 = arith.select %22, %25, %26 : vector<16x64xi1>, vector<16x64xf32>
    %28 = arith.addf %19, %27 : vector<16x64xf32>
    %29 = vector.extract_strided_slice %3 {offsets = [0, 2], sizes = [16, 1], strides = [1, 1]} : vector<16x8xi32> to vector<16x1xi32>
    %30 = vector.broadcast %29 : vector<16x1xi32> to vector<16x64xi32>
    %31 = arith.cmpi eq, %30, %9 : vector<16x64xi32>
    %32 = vector.extract_strided_slice %4 {offsets = [0, 2], sizes = [16, 1], strides = [1, 1]} : vector<16x8xf32> to vector<16x1xf32>
    %cst_8 = arith.constant 0.000000e+00 : f32
    %33 = vector.shape_cast %32 : vector<16x1xf32> to vector<16x1xf32>
    %34 = vector.broadcast %33 : vector<16x1xf32> to vector<16x64xf32>
    %35 = vector.broadcast %cst_8 : f32 to vector<16x64xf32>
    %36 = arith.select %31, %34, %35 : vector<16x64xi1>, vector<16x64xf32>
    %37 = arith.addf %28, %36 : vector<16x64xf32>
    %38 = vector.extract_strided_slice %3 {offsets = [0, 3], sizes = [16, 1], strides = [1, 1]} : vector<16x8xi32> to vector<16x1xi32>
    %39 = vector.broadcast %38 : vector<16x1xi32> to vector<16x64xi32>
    %40 = arith.cmpi eq, %39, %9 : vector<16x64xi32>
    %41 = vector.extract_strided_slice %4 {offsets = [0, 3], sizes = [16, 1], strides = [1, 1]} : vector<16x8xf32> to vector<16x1xf32>
    %cst_9 = arith.constant 0.000000e+00 : f32
    %42 = vector.shape_cast %41 : vector<16x1xf32> to vector<16x1xf32>
    %43 = vector.broadcast %42 : vector<16x1xf32> to vector<16x64xf32>
    %44 = vector.broadcast %cst_9 : f32 to vector<16x64xf32>
    %45 = arith.select %40, %43, %44 : vector<16x64xi1>, vector<16x64xf32>
    %46 = arith.addf %37, %45 : vector<16x64xf32>
    %47 = vector.extract_strided_slice %3 {offsets = [0, 4], sizes = [16, 1], strides = [1, 1]} : vector<16x8xi32> to vector<16x1xi32>
    %48 = vector.broadcast %47 : vector<16x1xi32> to vector<16x64xi32>
    %49 = arith.cmpi eq, %48, %9 : vector<16x64xi32>
    %50 = vector.extract_strided_slice %4 {offsets = [0, 4], sizes = [16, 1], strides = [1, 1]} : vector<16x8xf32> to vector<16x1xf32>
    %cst_10 = arith.constant 0.000000e+00 : f32
    %51 = vector.shape_cast %50 : vector<16x1xf32> to vector<16x1xf32>
    %52 = vector.broadcast %51 : vector<16x1xf32> to vector<16x64xf32>
    %53 = vector.broadcast %cst_10 : f32 to vector<16x64xf32>
    %54 = arith.select %49, %52, %53 : vector<16x64xi1>, vector<16x64xf32>
    %55 = arith.addf %46, %54 : vector<16x64xf32>
    %56 = vector.extract_strided_slice %3 {offsets = [0, 5], sizes = [16, 1], strides = [1, 1]} : vector<16x8xi32> to vector<16x1xi32>
    %57 = vector.broadcast %56 : vector<16x1xi32> to vector<16x64xi32>
    %58 = arith.cmpi eq, %57, %9 : vector<16x64xi32>
    %59 = vector.extract_strided_slice %4 {offsets = [0, 5], sizes = [16, 1], strides = [1, 1]} : vector<16x8xf32> to vector<16x1xf32>
    %cst_11 = arith.constant 0.000000e+00 : f32
    %60 = vector.shape_cast %59 : vector<16x1xf32> to vector<16x1xf32>
    %61 = vector.broadcast %60 : vector<16x1xf32> to vector<16x64xf32>
    %62 = vector.broadcast %cst_11 : f32 to vector<16x64xf32>
    %63 = arith.select %58, %61, %62 : vector<16x64xi1>, vector<16x64xf32>
    %64 = arith.addf %55, %63 : vector<16x64xf32>
    %65 = vector.extract_strided_slice %3 {offsets = [0, 6], sizes = [16, 1], strides = [1, 1]} : vector<16x8xi32> to vector<16x1xi32>
    %66 = vector.broadcast %65 : vector<16x1xi32> to vector<16x64xi32>
    %67 = arith.cmpi eq, %66, %9 : vector<16x64xi32>
    %68 = vector.extract_strided_slice %4 {offsets = [0, 6], sizes = [16, 1], strides = [1, 1]} : vector<16x8xf32> to vector<16x1xf32>
    %cst_12 = arith.constant 0.000000e+00 : f32
    %69 = vector.shape_cast %68 : vector<16x1xf32> to vector<16x1xf32>
    %70 = vector.broadcast %69 : vector<16x1xf32> to vector<16x64xf32>
    %71 = vector.broadcast %cst_12 : f32 to vector<16x64xf32>
    %72 = arith.select %67, %70, %71 : vector<16x64xi1>, vector<16x64xf32>
    %73 = arith.addf %64, %72 : vector<16x64xf32>
    %74 = vector.extract_strided_slice %3 {offsets = [0, 7], sizes = [16, 1], strides = [1, 1]} : vector<16x8xi32> to vector<16x1xi32>
    %75 = vector.broadcast %74 : vector<16x1xi32> to vector<16x64xi32>
    %76 = arith.cmpi eq, %75, %9 : vector<16x64xi32>
    %77 = vector.extract_strided_slice %4 {offsets = [0, 7], sizes = [16, 1], strides = [1, 1]} : vector<16x8xf32> to vector<16x1xf32>
    %cst_13 = arith.constant 0.000000e+00 : f32
    %78 = vector.shape_cast %77 : vector<16x1xf32> to vector<16x1xf32>
    %79 = vector.broadcast %78 : vector<16x1xf32> to vector<16x64xf32>
    %80 = vector.broadcast %cst_13 : f32 to vector<16x64xf32>
    %81 = arith.select %76, %79, %80 : vector<16x64xi1>, vector<16x64xf32>
    %82 = arith.addf %73, %81 : vector<16x64xf32>
    %c0_14 = arith.constant 0 : index
    %c0_15 = arith.constant 0 : index
    %83 = vector.load %arg6[%c0_14, %c0_15] : memref<16x128xf32, #tpu.memory_space<vmem>>, vector<16x128xf32>
    %cst_16 = arith.constant dense<0.000000e+00> : vector<16x128xf32>
    %84 = tpu.matmul %82, %5, %cst_16 {dimension_numbers = #tpu.dot_dimension_numbers<[1], [0], [0], [1], [0, 0, 1, 1], [], []>} : vector<16x64xf32>, vector<64x128xf32>, vector<16x128xf32> -> vector<16x128xf32>
    %85 = arith.addf %83, %84 : vector<16x128xf32>
    %c0_17 = arith.constant 0 : index
    %c0_18 = arith.constant 0 : index
    %86 = vector.load %arg6[%c0_17, %c0_18] : memref<16x128xf32, #tpu.memory_space<vmem>>, vector<16x128xf32>
    tpu.vector_store %arg6[%c0_17, %c0_18], %85 {strides = array<i32>} : memref<16x128xf32, #tpu.memory_space<vmem>>, vector<16x128xf32>,
    %c0_i32_19 = arith.constant 0 : i32
    %87 = arith.cmpi eq, %arg1, %c0_i32_19 : i32
    %88 = arith.extui %87 : i1 to i32
    %c0_i32_20 = arith.constant 0 : i32
    %89 = arith.cmpi ne, %88, %c0_i32_20 : i32
    scf.if %89 {
      %c0_21 = arith.constant 0 : index
      %c0_22 = arith.constant 0 : index
      %90 = vector.load %arg6[%c0_21, %c0_22] : memref<16x128xf32, #tpu.memory_space<vmem>>, vector<16x128xf32>
      %c0_23 = arith.constant 0 : index
      %c0_24 = arith.constant 0 : index
      %91 = vector.load %arg5[%c0_23, %c0_24] : memref<16x128xf32, #tpu.memory_space<vmem>>, vector<16x128xf32>
      tpu.vector_store %arg5[%c0_23, %c0_24], %90 {strides = array<i32>} : memref<16x128xf32, #tpu.memory_space<vmem>>, vector<16x128xf32>,
    } else {
    }
    return
  }
  func.func @transform_0(%arg0: i32, %arg1: i32) -> (i32, i32) {
    %c0_i32 = arith.constant 0 : i32
    %c0_i32_0 = arith.constant 0 : i32
    return %arg0, %c0_i32 : i32, i32
  }
  func.func @transform_1(%arg0: i32, %arg1: i32) -> (i32, i32) {
    %c0_i32 = arith.constant 0 : i32
    %c0_i32_0 = arith.constant 0 : i32
    return %arg0, %c0_i32 : i32, i32
  }
  func.func @transform_2(%arg0: i32, %arg1: i32) -> (i32, i32) {
    %c0_i32 = arith.constant 0 : i32
    %c0_i32_0 = arith.constant 0 : i32
    return %arg1, %c0_i32 : i32, i32
  }
  func.func @transform_3(%arg0: i32, %arg1: i32) -> (i32, i32) {
    %c0_i32 = arith.constant 0 : i32
    %c0_i32_0 = arith.constant 0 : i32
    return %arg0, %c0_i32 : i32, i32
  }
}

</mosaic_0001>

<bundles_post_ra>
// kernel: tpu_custom_call.1
= control target key start
LH: loop header
LB: loop body
LE: loop exit
PB: predicated region body
PF: predicated region fallthrough
CT: control target
= control target key end

     0   :  { %8 = vsyncpa [#allocation4], 0  ;;  %s544_s0 = inlined_call_operand.vmem [shape: s32[16,8], index: 0, kind: input, shape index: {}]   ;;  %s545_s1 = inlined_call_operand.vmem [shape: f32[16,8], index: 1, kind: input, shape index: {}]   ;;  %s546_s2 = inlined_call_operand.hbm [shape: f32[64,128], index: 2, kind: input, shape index: {}]   ;;  %s547_s3 = inlined_call_operand.hbm [shape: f32[16,128], index: 3, kind: output, shape index: {}]  }
   0x1   :  { %9 = vsyncpa [#allocation5], 0  ;;  %s450_s12 = smov [#allocation3]   ;;  %s402_s16 = scalar_lea.hbm %s546_s2, 1024 }
   0x2   :  { %s19_s13 = sshll.u32 %s450_s12, 4  ;;  %p403_p0 = scmp.ne.s32.totalorder %s546_s2, %s402_s16  ;;  %s20_s13 = int_to_ptr.vmem [resolvable:$true] %s19_s13 }
   0x3   :  { %p406_p1 = scmp.lt.u32.totalorder %s402_s16, %s546_s2 }
   0x5   :  { %p408_p2 = pnand %p406_p1, %p403_p0 }
   0x7   :  { %411 = shalt.err (!%p408_p2)
}
   0x8   :  { %s412_s21 = scalar_lea.vmem %s20_s13, 1024  ;;  %p417_p4 = scmp.lt.s32.totalorder %s20_s13, %s20_s13 }
   0x9   :  { %p413_p3 = scmp.ne.s32.totalorder %s20_s13, %s412_s21  ;;  %p418_p5 = scmp.lt.s32.totalorder %s412_s21, %s412_s21 }
   0xb   :  { %p419_p6 = por %p418_p5, %p417_p4 }
   0xd   :  { %p420_p7 = pnand %p419_p6, %p413_p3 }
   0xf   :  { %423 = shalt.err (!%p420_p7)
}
  0x10   :  { %s451_s22 = smov 128   ;;  %s452_s23 = smov 8  }
  0x11   :  { %25 = dma.hbm_to_vmem [thread:$0]  %s546_s2, 1024, %s20_s13, [#allocation4], %s451_s22, %s451_s22, %s452_s23  }
  0x12   :  { %446 = dma.done.wait [#allocation4], 1024  }
  0x13   :  { %447 = vsyncadd [#allocation4], 4294966272  ;;  %v453_v0 = vmov 0   ;;  %v500_v1 = vld [vmem:[%s544_s0 + $0x8] sm:$0xff]  ;;  %v35_v2 = vld [vmem:[%s544_s0] sm:$0xff]  ;;  %v454_v4 = vmov 1   ;;  %v47_v46 = vlaneseq }
  0x14   :  { %387 = vset.pattern.permute.xlu1 %v453_v0  ;;  %385 = vset.pattern.permute.xlu0 %v453_v0  ;;  %v509_v3 = vld [vmem:[%s545_s1] sm:$0xff]  ;;  %v38_v5 = vld [vmem:[%s545_s1 + $0x8] sm:$0xff]  ;;  %v455_v6 = vmov 2   ;;  %v456_v7 = vmov 3   ;;  %v457_v8 = vmov 4   ;;  %v458_v9 = vmov 5  }
  0x15   :  { %56 = vperm.xlu1 %387, %v500_v1   ;;  %53 = vperm.xlu0 %385, %v35_v2   ;;  %v459_v10 = vmov 6   ;;  %v460_v11 = vmov 7   ;;  %v39_v12 = vld [vmem:[#allocation3] sm:$0xff]  ;;  %v40_v13 = vld [vmem:[#allocation3 + $0x8] sm:$0xff]  ;;  %v41_v15 = vld [vmem:[#allocation3 + $0x10] sm:$0xff]  ;;  %v48_v49 = vand.u32 127, %v47_v46 }
  0x16   :  { %v357_v14 = vpack.c.bf16 %v40_v13, %v39_v12  ;;  %v42_v16 = vld [vmem:[#allocation3 + $0x18] sm:$0xff]  ;;  %v43_v18 = vld [vmem:[#allocation3 + $0x20] sm:$0xff]  ;;  %v44_v19 = vld [vmem:[#allocation3 + $0x28] sm:$0xff]  ;;  %s461_s1 = smov [#allocation6]  }
  0x17   :  { %v361_v17 = vpack.c.bf16 %v42_v16, %v41_v15  ;;  %v365_v20 = vpack.c.bf16 %v44_v19, %v43_v18  ;;  %v45_v21 = vld [vmem:[#allocation3 + $0x30] sm:$0xff]  ;;  %v46_v22 = vld [vmem:[#allocation3 + $0x38] sm:$0xff]  ;;  %s314_s5 = sshll.u32 %s461_s1, 4  ;;  %s315_s5 = int_to_ptr.vmem [resolvable:$true] %s314_s5 }
  0x18   :  { %358 = vmatprep.subr.bf16.mxu0 %v357_v14  ;;  %v369_v23 = vpack.c.bf16 %v46_v22, %v45_v21  ;;  %s424_s6 = scalar_lea.vmem %s315_s5, 256  ;;  %p429_p9 = scmp.lt.s32.totalorder %s315_s5, %s315_s5 }
  0x19   :  { %62 = vperm.xlu1 %387, %v509_v3   ;;  %386 = vset.pattern.permute.xlu0 %v454_v4  ;;  %p425_p8 = scmp.ne.s32.totalorder %s315_s5, %s424_s6  ;;  %p430_p10 = scmp.lt.s32.totalorder %s424_s6, %s424_s6 }
  0x1a   :  { %75 = vperm.xlu0 %386, %v35_v2   ;;  %360 = vmatpush3.bf16.msra.mxu0 %v357_v14 }
  0x1b   :  { %362 = vmatprep.subr.bf16.mxu0 %v361_v17  ;;  %p431_p11 = por %p430_p10, %p429_p9 }
  0x1d   :  { %388 = vset.pattern.permute.xlu1 %v454_v4  ;;  %p432_p12 = pnand %p431_p11, %p425_p8 }
  0x1e   :  { %78 = vperm.xlu1 %388, %v500_v1   ;;  %83 = vperm.xlu0 %386, %v509_v3  }
  0x1f   :  { %364 = vmatpush3.bf16.msra.mxu0 %v361_v17 }
  0x20   :  { %366 = vmatprep.subr.bf16.mxu0 %v365_v20 }
  0x22   :  { %389 = vset.pattern.permute.xlu1 %v453_v0  ;;  %87 = vperm.xlu0 %386, %v38_v5  }
  0x23   :  { %67 = vperm.xlu1 %389, %v38_v5   ;;  %368 = vmatpush3.bf16.msra.mxu0 %v365_v20 }
  0x24   :  { %370 = vmatprep.subr.bf16.mxu0 %v369_v23 }
  0x26   :  { %391 = vset.pattern.permute.xlu0 %v455_v6 }
  0x27   :  { %390 = vset.pattern.permute.xlu1 %v455_v6  ;;  %98 = vperm.xlu0 %391, %v500_v1  }
  0x28   :  { %95 = vperm.xlu1 %390, %v35_v2   ;;  %372 = vmatpush3.bf16.msra.mxu0 %v369_v23 }
  0x2b   :  { %392 = vset.pattern.permute.xlu0 %v456_v7 }
  0x2c   :  { %103 = vperm.xlu1 %390, %v509_v3   ;;  %115 = vperm.xlu0 %392, %v35_v2  }
  0x30   :  { %107 = vperm.xlu1 %390, %v38_v5   ;;  %127 = vperm.xlu0 %392, %v38_v5  }
  0x34   :  { %393 = vset.pattern.permute.xlu1 %v456_v7  ;;  %395 = vset.pattern.permute.xlu0 %v457_v8 }
  0x35   :  { %118 = vperm.xlu1 %393, %v500_v1   ;;  %138 = vperm.xlu0 %395, %v500_v1  }
  0x39   :  { %123 = vperm.xlu1 %393, %v509_v3   ;;  %396 = vset.pattern.permute.xlu0 %v458_v9 }
  0x3a   :  { %155 = vperm.xlu0 %396, %v35_v2  }
  0x3d   :  { %394 = vset.pattern.permute.xlu1 %v457_v8 }
  0x3e   :  { %135 = vperm.xlu1 %394, %v35_v2   ;;  %167 = vperm.xlu0 %396, %v38_v5  }
  0x42   :  { %143 = vperm.xlu1 %394, %v509_v3   ;;  %399 = vset.pattern.permute.xlu0 %v459_v10 }
  0x43   :  { %178 = vperm.xlu0 %399, %v500_v1  }
  0x46   :  { %147 = vperm.xlu1 %394, %v38_v5  }
  0x47   :  { %400 = vset.pattern.permute.xlu0 %v460_v11 }
  0x48   :  { %195 = vperm.xlu0 %400, %v35_v2  }
  0x4a   :  { %397 = vset.pattern.permute.xlu1 %v458_v9 }
  0x4b   :  { %158 = vperm.xlu1 %397, %v500_v1  }
  0x4c   :  { %207 = vperm.xlu0 %400, %v38_v5  }
  0x4f   :  { %163 = vperm.xlu1 %397, %v509_v3  }
  0x53   :  { %398 = vset.pattern.permute.xlu1 %v459_v10 }
  0x54   :  { %175 = vperm.xlu1 %398, %v35_v2  }
  0x58   :  { %183 = vperm.xlu1 %398, %v509_v3  }
  0x5c   :  { %187 = vperm.xlu1 %398, %v38_v5  }
  0x60   :  { %401 = vset.pattern.permute.xlu1 %v460_v11 }
  0x61   :  { %198 = vperm.xlu1 %401, %v500_v1  }
  0x65   :  { %203 = vperm.xlu1 %401, %v509_v3  }
  0x94   :  { %v57_v24 = vpop.permute.xlu1 %56  ;;  %v54_v27 = vpop.permute.xlu0 %53 }
  0x95   :  { %vm58_vm1 = vcmp.eq.s32.totalorder %v54_v27, %v48_v49  ;;  %vm59_vm2 = vcmp.eq.s32.totalorder %v57_v24, %v48_v49 }
  0x98   :  { %v63_v25 = vpop.permute.xlu1 %62 }
  0x99   :  { %v76_v29 = vpop.permute.xlu0 %75  ;;  %v70_v56 = vsel %vm58_vm1, %v63_v25, 0.0 }
  0x9a   :  { %vm80_vm0 = vcmp.eq.s32.totalorder %v76_v29, %v48_v49 }
  0x9d   :  { %v79_v26 = vpop.permute.xlu1 %78  ;;  %v84_v31 = vpop.permute.xlu0 %83 }
  0x9e   :  { %vm81_vm3 = vcmp.eq.s32.totalorder %v79_v26, %v48_v49  ;;  %v90_v52 = vsel %vm80_vm0, %v84_v31, 0.0  ;;  %vm216_vm0 = vcmask 523264  }
  0x9f   :  { %v92_v58 = vadd.f32 %v90_v52, %v70_v56 }
  0xa1   :  { %v88_v34 = vpop.permute.xlu0 %87 }
  0xa2   :  { %v68_v28 = vpop.permute.xlu1 %67  ;;  %v91_v54 = vsel %vm81_vm3, %v88_v34, 0.0 }
  0xa3   :  { %v71_v55 = vsel %vm59_vm2, %v68_v28, 0.0 }
  0xa4   :  { %v93_v60 = vadd.f32 %v91_v54, %v71_v55 }
  0xa6   :  { %v99_v36 = vpop.permute.xlu0 %98 }
  0xa7   :  { %v96_v30 = vpop.permute.xlu1 %95  ;;  %vm101_vm4 = vcmp.eq.s32.totalorder %v99_v36, %v48_v49 }
  0xa8   :  { %vm100_vm5 = vcmp.eq.s32.totalorder %v96_v30, %v48_v49 }
  0xab   :  { %v104_v32 = vpop.permute.xlu1 %103  ;;  %v116_v38 = vpop.permute.xlu0 %115 }
  0xac   :  { %vm120_vm6 = vcmp.eq.s32.totalorder %v116_v38, %v48_v49  ;;  %v110_v57 = vsel %vm100_vm5, %v104_v32, 0.0 }
  0xad   :  { %v112_v0 = vadd.f32 %v110_v57, %v92_v58 }
  0xaf   :  { %v108_v33 = vpop.permute.xlu1 %107  ;;  %v128_v40 = vpop.permute.xlu0 %127 }
  0xb0   :  { %v111_v59 = vsel %vm101_vm4, %v108_v33, 0.0 }
  0xb1   :  { %v113_v2 = vadd.f32 %v111_v59, %v93_v60 }
  0xb4   :  { %v119_v35 = vpop.permute.xlu1 %118  ;;  %v139_v42 = vpop.permute.xlu0 %138 }
  0xb5   :  { %vm121_vm7 = vcmp.eq.s32.totalorder %v119_v35, %v48_v49  ;;  %vm141_vm8 = vcmp.eq.s32.totalorder %v139_v42, %v48_v49 }
  0xb6   :  { %v131_v1 = vsel %vm121_vm7, %v128_v40, 0.0 }
  0xb7   :  { %v133_v6 = vadd.f32 %v131_v1, %v113_v2 }
  0xb8   :  { %v124_v37 = vpop.permute.xlu1 %123 }
  0xb9   :  { %v156_v45 = vpop.permute.xlu0 %155  ;;  %v130_v61 = vsel %vm120_vm6, %v124_v37, 0.0 }
  0xba   :  { %vm160_vm10 = vcmp.eq.s32.totalorder %v156_v45, %v48_v49  ;;  %v132_v4 = vadd.f32 %v130_v61, %v112_v0 }
  0xbd   :  { %v136_v39 = vpop.permute.xlu1 %135  ;;  %v168_v48 = vpop.permute.xlu0 %167 }
  0xbe   :  { %vm140_vm9 = vcmp.eq.s32.totalorder %v136_v39, %v48_v49 }
  0xc1   :  { %v144_v41 = vpop.permute.xlu1 %143 }
  0xc2   :  { %v179_v51 = vpop.permute.xlu0 %178  ;;  %v150_v3 = vsel %vm140_vm9, %v144_v41, 0.0 }
  0xc3   :  { %vm181_vm12 = vcmp.eq.s32.totalorder %v179_v51, %v48_v49  ;;  %v152_v8 = vadd.f32 %v150_v3, %v132_v4 }
  0xc5   :  { %v148_v43 = vpop.permute.xlu1 %147 }
  0xc6   :  { %v151_v5 = vsel %vm141_vm8, %v148_v43, 0.0 }
  0xc7   :  { %v196_v63 = vpop.permute.xlu0 %195  ;;  %v153_v11 = vadd.f32 %v151_v5, %v133_v6 }
  0xc8   :  { %vm200_vm15 = vcmp.eq.s32.totalorder %v196_v63, %v48_v49 }
  0xca   :  { %v159_v44 = vpop.permute.xlu1 %158 }
  0xcb   :  { %vm161_vm11 = vcmp.eq.s32.totalorder %v159_v44, %v48_v49  ;;  %v208_v13 = vpop.permute.xlu0 %207 }
  0xcc   :  { %v171_v9 = vsel %vm161_vm11, %v168_v48, 0.0 }
  0xcd   :  { %v173_v16 = vadd.f32 %v171_v9, %v153_v11 }
  0xce   :  { %v164_v47 = vpop.permute.xlu1 %163 }
  0xcf   :  { %v170_v7 = vsel %vm160_vm10, %v164_v47, 0.0 }
  0xd0   :  { %v172_v14 = vadd.f32 %v170_v7, %v152_v8 }
  0xd3   :  { %v176_v50 = vpop.permute.xlu1 %175 }
  0xd4   :  { %vm180_vm13 = vcmp.eq.s32.totalorder %v176_v50, %v48_v49 }
  0xd7   :  { %v184_v53 = vpop.permute.xlu1 %183 }
  0xd8   :  { %v190_v12 = vsel %vm180_vm13, %v184_v53, 0.0 }
  0xd9   :  { %v192_v17 = vadd.f32 %v190_v12, %v172_v14 }
  0xdb   :  { %v188_v62 = vpop.permute.xlu1 %187 }
  0xdc   :  { %v191_v15 = vsel %vm181_vm12, %v188_v62, 0.0 }
  0xdd   :  { %v193_v20 = vadd.f32 %v191_v15, %v173_v16 }
  0xe0   :  { %v199_v10 = vpop.permute.xlu1 %198 }
  0xe1   :  { %vm201_vm14 = vcmp.eq.s32.totalorder %v199_v10, %v48_v49 }
  0xe2   :  { %v211_v18 = vsel %vm201_vm14, %v208_v13, 0.0 }
  0xe3   :  { %v213_v23 = vadd.f32 %v211_v18, %v193_v20 }
  0xe4   :  { %v204_v19 = vpop.permute.xlu1 %203 }
  0xe5   :  { %v210_v21 = vsel %vm200_vm15, %v204_v19, 0.0 }
  0xe6   :  { %v212_v22 = vadd.f32 %v210_v21, %v192_v17 }
  0xe8   :  { %354 = vmatprep.mubr.msk.f32.mxu0 %vm216_vm0, %v212_v22 }
  0xe9   :  { %355 = vmatmul.mubr.msk.f32.vlgmr.msra.gmra.mrb[0].mxu0 %vm216_vm0, %v213_v23 }
 0x1bc   :  { %v356_v24 = vpop.f32.mrb[0].mxu0 }
 0x1bd   :  { %308 = vst [vmem:[#allocation6 + $0x8] sm:$0xff] %v356_v24  ;;  %v289_v25 = vpop.f32.mrb[1].mxu0 }
 0x1be   :  { %307 = vst [vmem:[#allocation6] sm:$0xff] %v289_v25 }
 0x1bf   :  { %435 = shalt.err (!%p432_p12)
}
 0x1c0   :  { %s436_s9 = scalar_lea.hbm %s547_s3, 256 }
 0x1c1   :  { %p437_p13 = scmp.ne.s32.totalorder %s547_s3, %s436_s9  ;;  %p440_p0 = scmp.lt.u32.totalorder %s436_s9, %s547_s3 }
 0x1c3   :  { %p442_p1 = pnand %p440_p0, %p437_p13 }
 0x1c5   :  { %445 = shalt.err (!%p442_p1)
}
 0x1c6   :  { %320 = dma.vmem_to_hbm [thread:$0]  %s315_s5, 256, %s547_s3, [#allocation5], %s451_s22, %s451_s22, %s452_s23  }
 0x1c7   :  { %448 = dma.done.wait [#allocation5], 256  }
 0x1c8   :  { %449 = vsyncadd [#allocation5], 4294967040 }
 0x1c9   :  { %324 = vsyncpa [#allocation4], 1 }
 0x1ca   :  { %325 = vsyncpa [#allocation5], 1 }

</bundles_post_ra>
